<compile_context>
chip_gen: v7x
topology: tpu7x:2x2x1
jax: 0.10.0
libtpu: 0.0.40
codegen_flags: <defaults>
</compile_context>

<pallas_src>
import functools

import jax
import jax.numpy as jnp
from jax import lax
from jax.experimental import pallas as pl
from jax.experimental.pallas import tpu as pltpu

_VMEM_LIMIT_BYTES = 48 * 1024 * 1024  # > 32 MiB scoped default, < v7x 64 MiB physical


def _round_up(x: int, m: int) -> int:
    return (x + m - 1) // m * m


# ---------------------------------------------------------------------------
# Pass A: conv-as-matmul tile -> per-tile partial sum / sumsq (no y writeback).
# Padded M rows of the patches are all-zero, so they contribute exactly 0 to
# both sums; the wrapper divides by the true M.
# ---------------------------------------------------------------------------
def _conv_stats_kernel(p_ref, w_ref, part_ref):
    y = jnp.dot(p_ref[...], w_ref[...], preferred_element_type=jnp.float32)
    s = jnp.sum(y, axis=0, keepdims=True)        # (1, Cout_p)
    q = jnp.sum(y * y, axis=0, keepdims=True)    # (1, Cout_p)
    pad = jnp.zeros((6, y.shape[1]), jnp.float32)
    part_ref[...] = jnp.concatenate([s, q, pad], axis=0)   # (8, Cout_p) dense store


# ---------------------------------------------------------------------------
# Pass B: recompute conv tile, apply folded BN affine (+ optional ReLU).
# ---------------------------------------------------------------------------
def _conv_bn_kernel(p_ref, w_ref, scale_ref, shift_ref, o_ref, *, apply_relu):
    y = jnp.dot(p_ref[...], w_ref[...], preferred_element_type=jnp.float32)
    out = y * scale_ref[...] + shift_ref[...]
    if apply_relu:  # act=False default -> Identity
        out = jnp.maximum(out, 0.0)
    o_ref[...] = out.astype(o_ref.dtype)


# ---------------------------------------------------------------------------
# Wrapper
# ---------------------------------------------------------------------------
def downsample(x, weight, gamma, beta, *, stride=2, act=False, eps=1e-5,
               block_m=1024, matmul_dtype=jnp.bfloat16):
    """x: (N, Cin, L) float32 (PyTorch NCL); weight: (Cout, Cin, K)."""
    N, Cin, L = x.shape
    Cout, _, K = weight.shape
    pad = (K - 1) // 2
    L_out = (L + 2 * pad - K) // stride + 1
    M = N * L_out

    Kc = K * Cin
    Kc_p = _round_up(Kc, 128)       # lane-align contraction dim
    Cout_p = _round_up(Cout, 128)   # lane-align output dim (dense vst)
    TM = min(_round_up(block_m, 8), _round_up(M, 8))
    M_pad = _round_up(M, TM)
    num_tiles = M_pad // TM

    # ---- glue: channels-last im2col via K static strided slices (no gather) ----
    x_pad = jnp.pad(x.astype(matmul_dtype), ((0, 0), (0, 0), (pad, pad)))
    cols = [lax.slice_in_dim(x_pad, k, k + (L_out - 1) * stride + 1,
                             stride=stride, axis=2) for k in range(K)]
    patches = jnp.stack(cols, axis=0)                               # (K, N, Cin, L_out)
    patches = jnp.transpose(patches, (1, 3, 0, 2)).reshape(M, Kc)   # rows (n,l), cols (k,cin)
    patches = jnp.pad(patches, ((0, M_pad - M), (0, Kc_p - Kc)))    # zero pad -> zero stats

    # weight (Cout, Cin, K) -> (K*Cin, Cout), padded + bf16, matching col order.
    w_mat = jnp.transpose(weight, (2, 1, 0)).reshape(Kc, Cout).astype(matmul_dtype)
    w_mat = jnp.pad(w_mat, ((0, Kc_p - Kc), (0, Cout_p - Cout)))

    # ---- pass A: per-tile partial statistics (fully parallel grid) ----
    partials = pl.pallas_call(
        _conv_stats_kernel,
        out_shape=jax.ShapeDtypeStruct((num_tiles * 8, Cout_p), jnp.float32),
        grid=(num_tiles,),
        in_specs=[pl.BlockSpec((TM, Kc_p), lambda i: (i, 0)),
                  pl.BlockSpec((Kc_p, Cout_p), lambda i: (0, 0),
                               pipeline_mode=pl.Buffered(1))],
        out_specs=pl.BlockSpec((8, Cout_p), lambda i: (i, 0)),
        compiler_params=pltpu.CompilerParams(
            dimension_semantics=("parallel",),
            vmem_limit_bytes=_VMEM_LIMIT_BYTES),
    )(patches, w_mat)

    # ---- tiny stats finalization in the wrapper: fold into scale/shift ----
    partials = partials.reshape(num_tiles, 8, Cout_p)
    ysum = jnp.sum(partials[:, 0, :], axis=0)          # (Cout_p,)
    ysq = jnp.sum(partials[:, 1, :], axis=0)           # (Cout_p,)

    g = jnp.pad(gamma.astype(jnp.float32), (0, Cout_p - Cout))
    b = jnp.pad(beta.astype(jnp.float32), (0, Cout_p - Cout))
    inv_m = 1.0 / M
    mean = ysum * inv_m
    var = jnp.maximum(ysq * inv_m - mean * mean, 0.0)   # biased batch variance
    scale = g * lax.rsqrt(var + eps)                    # padded ch: g=0 -> scale=0
    shift = b - mean * scale
    scale = scale.reshape(1, Cout_p)
    shift = shift.reshape(1, Cout_p)

    # ---- pass B: recompute conv tile + BN affine (+ ReLU), parallel grid ----
    kernel_b = functools.partial(_conv_bn_kernel, apply_relu=act)
    out2d = pl.pallas_call(
        kernel_b,
        out_shape=jax.ShapeDtypeStruct((M_pad, Cout_p), jnp.float32),
        grid=(num_tiles,),
        in_specs=[pl.BlockSpec((TM, Kc_p), lambda i: (i, 0)),
                  pl.BlockSpec((Kc_p, Cout_p), lambda i: (0, 0),
                               pipeline_mode=pl.Buffered(1)),
                  pl.BlockSpec((1, Cout_p), lambda i: (0, 0),
                               pipeline_mode=pl.Buffered(1)),
                  pl.BlockSpec((1, Cout_p), lambda i: (0, 0),
                               pipeline_mode=pl.Buffered(1))],
        out_specs=pl.BlockSpec((TM, Cout_p), lambda i: (i, 0)),
        compiler_params=pltpu.CompilerParams(
            dimension_semantics=("parallel",),
            vmem_limit_bytes=_VMEM_LIMIT_BYTES),
    )(patches, w_mat, scale, shift)

    # strip padding; module semantics require NCL (N, Cout, L_out).
    # TODO(synk): a consumer that accepts NLC could skip this transpose pass.
    out2d = out2d[:M, :Cout]
    return jnp.transpose(out2d.reshape(N, L_out, Cout), (0, 2, 1))


# ---------------------------------------------------------------------------
# Pure-JAX reference (same bf16 rounding of matmul inputs, f32 accumulation).
# ---------------------------------------------------------------------------
def _reference(x, weight, gamma, beta, *, stride=2, act=False, eps=1e-5,
               matmul_dtype=jnp.bfloat16):
    xq = x.astype(matmul_dtype).astype(jnp.float32)
    wq = weight.astype(matmul_dtype).astype(jnp.float32)
    pad = (weight.shape[2] - 1) // 2
    y = lax.conv_general_dilated(
        xq, wq, window_strides=(stride,), padding=[(pad, pad)],
        dimension_numbers=("NCH", "OIH", "NCH"))
    mean = jnp.mean(y, axis=(0, 2), keepdims=True)
    var = jnp.mean((y - mean) ** 2, axis=(0, 2), keepdims=True)
    y = (y - mean) / jnp.sqrt(var + eps)
    y = y * gamma[None, :, None] + beta[None, :, None]
    if act:
        y = jnp.maximum(y, 0.0)
    return y


if __name__ == "__main__":
    key = jax.random.PRNGKey(0)

    # Case 1: module-default small shapes (single M tile).
    N, Cin, Cout, L, K = 2, 4, 8, 16, 3
    k1, k2, k3, k4, key = jax.random.split(key, 5)
    x = jax.random.normal(k1, (N, Cin, L), jnp.float32)
    weight = jax.random.normal(k2, (Cout, Cin, K), jnp.float32) * 0.1
    gamma = 1.0 + 0.1 * jax.random.normal(k3, (Cout,), jnp.float32)
    beta = 0.1 * jax.random.normal(k4, (Cout,), jnp.float32)

    out = jax.block_until_ready(downsample(x, weight, gamma, beta))
    ref = _reference(x, weight, gamma, beta)
    L_out = (L + 2 * 1 - K) // 2 + 1
    assert out.shape == ref.shape == (N, Cout, L_out)
    if not jnp.allclose(out, ref, atol=1e-3, rtol=1e-3):
        raise AssertionError("case1: Pallas kernel output mismatch vs reference")

    # Case 2: multi-tile grid with M not a multiple of the tile (zero-padded
    # rows must not bias the batch statistics), with ReLU.
    N2, Cin2, Cout2, L2, K2 = 4, 16, 32, 64, 3
    k1, k2, k3, k4, key = jax.random.split(key, 5)
    x2 = jax.random.normal(k1, (N2, Cin2, L2), jnp.float32)
    w2 = jax.random.normal(k2, (Cout2, Cin2, K2), jnp.float32) * 0.1
    g2 = 1.0 + 0.1 * jax.random.normal(k3, (Cout2,), jnp.float32)
    b2 = 0.1 * jax.random.normal(k4, (Cout2,), jnp.float32)

    out2 = jax.block_until_ready(
        downsample(x2, w2, g2, b2, act=True, block_m=48))  # M=128 -> 3 tiles of 48
    ref2 = _reference(x2, w2, g2, b2, act=True)
    assert out2.shape == ref2.shape
    if not jnp.allclose(out2, ref2, atol=1e-3, rtol=1e-3):
        raise AssertionError("case2: Pallas kernel output mismatch vs reference")

    print("KERNEL_OK")
</pallas_src>

<mosaic_0001>
module attributes {stable_mosaic.version = 11 : i64} {
  func.func @_conv_stats_kernel(%arg0: i32, %arg1: memref<16x128xbf16, #tpu.memory_space<vmem>>, %arg2: memref<128x128xbf16, #tpu.memory_space<vmem>>, %arg3: memref<8x128xf32, #tpu.memory_space<vmem>>) attributes {dimension_semantics = [#tpu.dimension_semantics<parallel>], iteration_bounds = array<i64: 1>, scalar_prefetch = 0 : i64, scratch_operands = 0 : i64, tpu.core_type = #tpu.core_type<tc>, window_params = [{transform_indices = @transform_0, window_bounds = array<i64: 16, 128>}, {pipeline_mode = #tpu.pipeline_mode<synchronous>, transform_indices = @transform_1, window_bounds = array<i64: 128, 128>}, {transform_indices = @transform_2, window_bounds = array<i64: 8, 128>}]} {
    %c0 = arith.constant 0 : index
    %c0_0 = arith.constant 0 : index
    %0 = vector.load %arg1[%c0, %c0_0] : memref<16x128xbf16, #tpu.memory_space<vmem>>, vector<16x128xbf16>
    %c0_1 = arith.constant 0 : index
    %c0_2 = arith.constant 0 : index
    %1 = vector.load %arg2[%c0_1, %c0_2] : memref<128x128xbf16, #tpu.memory_space<vmem>>, vector<128x128xbf16>
    %cst = arith.constant dense<0.000000e+00> : vector<16x128xf32>
    %2 = tpu.matmul %0, %1, %cst {dimension_numbers = #tpu.dot_dimension_numbers<[1], [0], [0], [1], [0, 0, 1, 1], [], []>} : vector<16x128xbf16>, vector<128x128xbf16>, vector<16x128xf32> -> vector<16x128xf32>
    %cst_3 = arith.constant dense<0.000000e+00> : vector<128xf32>
    %3 = vector.multi_reduction <add>, %2, %cst_3 [0] : vector<16x128xf32> to vector<128xf32>
    %4 = vector.shape_cast %3 : vector<128xf32> to vector<1x128xf32>
    %5 = arith.mulf %2, %2 : vector<16x128xf32>
    %cst_4 = arith.constant dense<0.000000e+00> : vector<128xf32>
    %6 = vector.multi_reduction <add>, %5, %cst_4 [0] : vector<16x128xf32> to vector<128xf32>
    %7 = vector.shape_cast %6 : vector<128xf32> to vector<1x128xf32>
    %cst_5 = arith.constant 0.000000e+00 : f32
    %8 = vector.broadcast %cst_5 : f32 to vector<6x128xf32>
    %9 = tpu.concatenate %4, %7, %8 in 0 : vector<1x128xf32>, vector<1x128xf32>, vector<6x128xf32> -> vector<8x128xf32>
    %c0_6 = arith.constant 0 : index
    %c0_7 = arith.constant 0 : index
    %10 = vector.load %arg3[%c0_6, %c0_7] : memref<8x128xf32, #tpu.memory_space<vmem>>, vector<8x128xf32>
    tpu.vector_store %arg3[%c0_6, %c0_7], %9 {strides = array<i32>} : memref<8x128xf32, #tpu.memory_space<vmem>>, vector<8x128xf32>,
    return
  }
  func.func @transform_0(%arg0: i32) -> (i32, i32) {
    %c0_i32 = arith.constant 0 : i32
    %c0_i32_0 = arith.constant 0 : i32
    return %arg0, %c0_i32 : i32, i32
  }
  func.func @transform_1(%arg0: i32) -> (i32, i32) {
    %c0_i32 = arith.constant 0 : i32
    %c0_i32_0 = arith.constant 0 : i32
    %c0_i32_1 = arith.constant 0 : i32
    return %c0_i32, %c0_i32_0 : i32, i32
  }
  func.func @transform_2(%arg0: i32) -> (i32, i32) {
    %c0_i32 = arith.constant 0 : i32
    %c0_i32_0 = arith.constant 0 : i32
    return %arg0, %c0_i32 : i32, i32
  }
}

</mosaic_0001>

<bundles_post_ra>
// kernel: tpu_custom_call.1
= control target key start
LH: loop header
LB: loop body
LE: loop exit
PB: predicated region body
PF: predicated region fallthrough
CT: control target
= control target key end

     0   :  { %7 = vsyncpa [#allocation3], 0  ;;  %s375_s0 = inlined_call_operand.hbm [shape: bf16[16,128], index: 0, kind: input, shape index: {}]   ;;  %s376_s1 = inlined_call_operand.hbm [shape: bf16[128,128], index: 1, kind: input, shape index: {}]   ;;  %s377_s2 = inlined_call_operand.hbm [shape: f32[8,128], index: 2, kind: output, shape index: {}]  }
   0x1   :  { %8 = vsyncpa [#allocation6], 0 }
   0x2   :  { %9 = vsyncpa [#allocation4], 0  ;;  %s317_s9 = smov [#allocation2]   ;;  %s245_s13 = scalar_lea.hbm %s375_s0, 128 }
   0x3   :  { %s15_s10 = sshll.u32 %s317_s9, 4  ;;  %p246_p0 = scmp.ne.s32.totalorder %s375_s0, %s245_s13  ;;  %s16_s10 = int_to_ptr.vmem [resolvable:$true] %s15_s10 }
   0x4   :  { %p249_p1 = scmp.lt.u32.totalorder %s245_s13, %s375_s0 }
   0x6   :  { %p251_p2 = pnand %p249_p1, %p246_p0 }
   0x8   :  { %254 = shalt.err (!%p251_p2)
}
   0x9   :  { %s255_s18 = scalar_lea.vmem %s16_s10, 128  ;;  %p260_p4 = scmp.lt.s32.totalorder %s16_s10, %s16_s10 }
   0xa   :  { %p256_p3 = scmp.ne.s32.totalorder %s16_s10, %s255_s18  ;;  %p261_p5 = scmp.lt.s32.totalorder %s255_s18, %s255_s18 }
   0xc   :  { %p262_p6 = por %p261_p5, %p260_p4 }
   0xe   :  { %p263_p7 = pnand %p262_p6, %p256_p3 }
  0x10   :  { %266 = shalt.err (!%p263_p7)
}
  0x11   :  { %s318_s19 = smov 64   ;;  %s319_s20 = smov 4  }
  0x12   :  { %21 = dma.hbm_to_vmem [thread:$0]  %s375_s0, 128, %s16_s10, [#allocation3], %s318_s19, %s318_s19, %s319_s20  }
  0x13   :  { %s320_s23 = smov [#allocation5]   ;;  %s267_s27 = scalar_lea.hbm %s376_s1, 1024 }
  0x14   :  { %s27_s24 = sshll.u32 %s320_s23, 4  ;;  %p268_p8 = scmp.ne.s32.totalorder %s376_s1, %s267_s27  ;;  %s28_s24 = int_to_ptr.vmem [resolvable:$true] %s27_s24 }
  0x15   :  { %p271_p9 = scmp.lt.u32.totalorder %s267_s27, %s376_s1 }
  0x17   :  { %p273_p10 = pnand %p271_p9, %p268_p8 }
  0x19   :  { %276 = shalt.err (!%p273_p10)
}
  0x1a   :  { %s277_s4 = scalar_lea.vmem %s28_s24, 1024  ;;  %p282_p12 = scmp.lt.s32.totalorder %s28_s24, %s28_s24 }
  0x1b   :  { %p278_p11 = scmp.ne.s32.totalorder %s28_s24, %s277_s4  ;;  %p283_p13 = scmp.lt.s32.totalorder %s277_s4, %s277_s4 }
  0x1d   :  { %p284_p0 = por %p283_p13, %p282_p12 }
  0x1f   :  { %p285_p1 = pnand %p284_p0, %p278_p11 }
  0x21   :  { %288 = shalt.err (!%p285_p1)
}
  0x22   :  { %33 = dma.hbm_to_vmem [thread:$0]  %s376_s1, 1024, %s28_s24, [#allocation6], %s318_s19, %s318_s19, %s319_s20  }
  0x23   :  { %311 = dma.done.wait [#allocation3], 128  }
  0x24   :  { %312 = vsyncadd [#allocation3], 4294967168 }
  0x25   :  { %313 = dma.done.wait [#allocation6], 1024  }
  0x26   :  { %314 = vsyncadd [#allocation6], 4294966272  ;;  %v321_v0 = vmov 0.0   ;;  %vm322_vm0 = vmmov 0   ;;  %v236_v1 = vld [vmem:[#allocation5] sm:$0xff]   ;;  %v237_v2 = vld [vmem:[#allocation5 + $0x8] sm:$0xff]  }
  0x27   :  { %209 = vmatprep.subr.bf16.mxu0 %v321_v0  ;;  %225 = vmatprep.mubr.msk.bf16.mxu0 %vm322_vm0, %v321_v0  ;;  %v238_v3 = vld [vmem:[#allocation5 + $0x10] sm:$0xff]   ;;  %v239_v4 = vld [vmem:[#allocation5 + $0x18] sm:$0xff]   ;;  %v240_v5 = vld [vmem:[#allocation5 + $0x20] sm:$0xff]   ;;  %vm170_vm1 = vcmask 1040384   ;;  %s323_s1 = smov [#allocation7]   ;;  %vm172_vm2 = vcmask 1041408  }
  0x28   :  { %210 = vmatpush3.bf16.msra.mxu0 %v236_v1  ;;  %v241_v6 = vld [vmem:[#allocation5 + $0x28] sm:$0xff]   ;;  %v242_v7 = vld [vmem:[#allocation5 + $0x30] sm:$0xff]   ;;  %v243_v8 = vld [vmem:[#allocation5 + $0x38] sm:$0xff]   ;;  %s181_s6 = sshll.u32 %s323_s1, 4  ;;  %s182_s6 = int_to_ptr.vmem [resolvable:$true] %s181_s6 }
  0x29   :  { %211 = vmatprep.subr.bf16.mxu0 %v321_v0  ;;  %v244_v9 = vld [vmem:[#allocation2] sm:$0xff]   ;;  %s289_s7 = scalar_lea.vmem %s182_s6, 128  ;;  %p294_p3 = scmp.lt.s32.totalorder %s182_s6, %s182_s6 }
  0x2a   :  { %p290_p2 = scmp.ne.s32.totalorder %s182_s6, %s289_s7  ;;  %p295_p4 = scmp.lt.s32.totalorder %s289_s7, %s289_s7 }
  0x2c   :  { %212 = vmatpush3.bf16.msra.mxu0 %v237_v2  ;;  %p296_p5 = por %p295_p4, %p294_p3 }
  0x2d   :  { %213 = vmatprep.subr.bf16.mxu0 %v321_v0 }
  0x2e   :  { %p297_p6 = pnand %p296_p5, %p290_p2 }
  0x30   :  { %214 = vmatpush3.bf16.msra.mxu0 %v238_v3 }
  0x31   :  { %215 = vmatprep.subr.bf16.mxu0 %v321_v0 }
  0x34   :  { %216 = vmatpush3.bf16.msra.mxu0 %v239_v4 }
  0x35   :  { %217 = vmatprep.subr.bf16.mxu0 %v321_v0 }
  0x38   :  { %218 = vmatpush3.bf16.msra.mxu0 %v240_v5 }
  0x39   :  { %219 = vmatprep.subr.bf16.mxu0 %v321_v0 }
  0x3c   :  { %220 = vmatpush3.bf16.msra.mxu0 %v241_v6 }
  0x3d   :  { %221 = vmatprep.subr.bf16.mxu0 %v321_v0 }
  0x40   :  { %222 = vmatpush3.bf16.msra.mxu0 %v242_v7 }
  0x41   :  { %223 = vmatprep.subr.bf16.mxu0 %v321_v0 }
  0x44   :  { %224 = vmatpush3.bf16.msra.mxu0 %v243_v8 }
  0x47   :  { %226 = vmatmul.mubr.bf16.vlgmr.msra.gmra.mrb[0].mxu0 %v244_v9 }
 0x11a   :  { %v147_v10 = vpop.f32.mrb[0].mxu0 }
 0x11b   :  { %v227_v11 = vpop.f32.mrb[1].mxu0  ;;  %v161_v13 = vmul.f32 %v147_v10, %v147_v10 }
 0x11c   :  { %v150_v12 = vpop.f32.mrb[2].mxu0 }
 0x11d   :  { %v154_v14 = vadd.f32 %v150_v12, %v147_v10  ;;  %v162_v15 = vmul.f32 %v150_v12, %v150_v12  ;;  %v228_v16 = vpop.f32.mrb[3].mxu0 }
 0x11f   :  { %v155_v17 = vrot.slane %v154_v14, 4  ;;  %v163_v18 = vadd.f32 %v162_v15, %v161_v13 }
 0x121   :  { %v156_v19 = vadd.f32 %v155_v17, %v154_v14  ;;  %v164_v20 = vrot.slane %v163_v18, 4 }
 0x123   :  { %v157_v21 = vrot.slane %v156_v19, 2  ;;  %v165_v22 = vadd.f32 %v164_v20, %v163_v18 }
 0x125   :  { %v158_v23 = vadd.f32 %v157_v21, %v156_v19  ;;  %v166_v24 = vrot.slane %v165_v22, 2 }
 0x127   :  { %v159_v25 = vrot.slane %v158_v23, 1  ;;  %v167_v26 = vadd.f32 %v166_v24, %v165_v22 }
 0x129   :  { %v168_v27 = vrot.slane %v167_v26, 1  ;;  %v160_v28 = vadd.f32 %v159_v25, %v158_v23 }
 0x12b   :  { %v169_v29 = vadd.f32 %v168_v27, %v167_v26 }
 0x12d   :  { %v171_v30 = vsel %vm170_vm1, %v160_v28, %v169_v29 }
 0x12e   :  { %v173_v31 = vsel %vm172_vm2, %v171_v30, 0.0 }
 0x12f   :  { %174 = vst [vmem:[#allocation7] sm:$0xff] %v173_v31 }
 0x130   :  { %300 = shalt.err (!%p297_p6)
}
 0x131   :  { %s301_s10 = scalar_lea.hbm %s377_s2, 128 }
 0x132   :  { %p302_p7 = scmp.ne.s32.totalorder %s377_s2, %s301_s10  ;;  %p305_p8 = scmp.lt.u32.totalorder %s301_s10, %s377_s2 }
 0x134   :  { %p307_p9 = pnand %p305_p8, %p302_p7 }
 0x136   :  { %310 = shalt.err (!%p307_p9)
}
 0x137   :  { %184 = dma.vmem_to_hbm [thread:$0]  %s182_s6, 128, %s377_s2, [#allocation4]  }
 0x138   :  { %315 = dma.done.wait [#allocation4], 128  }
 0x139   :  { %316 = vsyncadd [#allocation4], 4294967168 }
 0x13a   :  { %188 = vsyncpa [#allocation3], 1 }
 0x13b   :  { %189 = vsyncpa [#allocation6], 1 }
 0x13c   :  { %190 = vsyncpa [#allocation4], 1 }

</bundles_post_ra>
